<compile_context>
chip_gen: v7x
topology: tpu7x:2x2x1
jax: 0.10.0
libtpu: 0.0.40
codegen_flags: <defaults>
</compile_context>

<pallas_src>
import jax
import jax.numpy as jnp
from jax.experimental import pallas as pl
from jax.experimental.pallas import tpu as pltpu


# --------------------------------------------------------------------------
# Kernels
# --------------------------------------------------------------------------
def _attention_kernel_nomask(x_ref, w_ref, rep_ref, attn_ref):
    """One batch tile, no length mask.

    x_ref    : (TB, L, H) inputs (native dtype)
    w_ref    : (1, H)     attention weight vector
    rep_ref  : (TB, H)    output representations
    attn_ref : (TB, L)    output attention weights
    """
    w = w_ref[...].astype(jnp.float32)                        # (1, H)

    # scores[b, l] = relu(sum_h x[b, l, h] * w[h])
    # (VPU mul against the lane-replicated w, cheap cross-chunk adds; the
    #  transient f32 product is not kept live past this statement.)
    scores = jnp.sum(x_ref[...].astype(jnp.float32) * w, axis=-1)   # (TB, L)
    scores = jnp.maximum(scores, 0.0)

    # numerically stable softmax over L (lane dim), single normalization
    m = jnp.max(scores, axis=-1, keepdims=True)
    e = jnp.exp(scores - m)
    den = jnp.sum(e, axis=-1, keepdims=True)
    attn = e * pl.reciprocal(den, approx=False)                # exact: matches ref

    # representations[b, h] = sum_l attn[b, l] * x[b, l, h]
    # (lane-broadcast of the (TB, L, 1) operand is reused across H chunks,
    #  reduction over L is mostly cross-vreg VPU adds.)
    rep = jnp.sum(x_ref[...].astype(jnp.float32) * attn[:, :, None], axis=1)

    rep_ref[...] = rep.astype(rep_ref.dtype)
    attn_ref[...] = attn.astype(attn_ref.dtype)


def _attention_kernel_masked(x_ref, w_ref, len_ref, rep_ref, attn_ref):
    """One batch tile with per-row valid lengths (len_ref: (TB, 1) int32)."""
    w = w_ref[...].astype(jnp.float32)                         # (1, H)

    scores = jnp.sum(x_ref[...].astype(jnp.float32) * w, axis=-1)   # (TB, L)
    scores = jnp.maximum(scores, 0.0)

    tb, seq_len = scores.shape
    pos = jax.lax.broadcasted_iota(jnp.int32, (tb, seq_len), 1)
    mask = (pos < len_ref[...]).astype(jnp.float32)             # (TB, L)

    # Fused mask + normalization: softmax(s) masked & renormalized is
    # identical to exp(s - m) * mask / sum(exp(s - m) * mask).
    # NOTE: rows with length 0 give 0/0 (NaN), same as the PyTorch reference.
    m = jnp.max(scores, axis=-1, keepdims=True)
    e = jnp.exp(scores - m) * mask
    den = jnp.sum(e, axis=-1, keepdims=True)
    attn = e * pl.reciprocal(den, approx=False)

    rep = jnp.sum(x_ref[...].astype(jnp.float32) * attn[:, :, None], axis=1)

    rep_ref[...] = rep.astype(rep_ref.dtype)
    attn_ref[...] = attn.astype(attn_ref.dtype)


# --------------------------------------------------------------------------
# Tiling helpers
# --------------------------------------------------------------------------
def _vmem_capacity_bytes():
    """Per-core VMEM capacity; conservative fallback (v7x = 64 MiB)."""
    try:
        return int(pltpu.get_tpu_info().vmem_capacity_bytes)
    except Exception:
        return 64 * 1024 * 1024


def _choose_batch_tile(B, L, H, itemsize, x_budget_bytes):
    """Pick (batch_tile, padded_batch).

    Constraints: the tile must be a multiple of 8 (sublane alignment of the
    2-D output blocks) or equal to the full batch; the double-buffered input
    tile plus the transient f32 product should fit the per-buffer budget; and
    for large batches we keep >=2 grid steps so both v7x TensorCores get work.
    """
    # native input bytes + transient f32 product per batch row
    bytes_per_row = max(1, L * H * (itemsize + 4))
    if B <= 8:
        return B, B                      # full-dim block is always legal

    rows_cap = max(8, x_budget_bytes // bytes_per_row)
    target = min(rows_cap, B if B < 16 else max(8, B // 2))
    tb = max(8, (target // 8) * 8)

    # Prefer a multiple-of-8 divisor of B (no padded rows).
    t = tb
    while t >= 8:
        if B % t == 0:
            return t, B
        t -= 8

    # Otherwise pad B: pick the multiple-of-8 tile (<= tb) that minimizes the
    # padded total, tie-breaking towards larger tiles.
    best = min(range(8, tb + 1, 8),
               key=lambda c: (((B + c - 1) // c) * c, -c))
    b_pad = ((B + best - 1) // best) * best
    return best, b_pad


# --------------------------------------------------------------------------
# Wrapper
# --------------------------------------------------------------------------
def attention_forward(inputs, att_weights, lengths=None):
    """Pallas TPU forward of the PyTorch `Attention` module (batch-first).

    inputs      : (B, L, H)
    att_weights : (1, H)
    lengths     : optional (B,) int valid lengths
    returns (representations (B, H), attentions (B, L))
    """
    B, L, H = inputs.shape
    assert att_weights.shape == (1, H)

    itemsize = jnp.dtype(inputs.dtype).itemsize
    vmem_cap = _vmem_capacity_bytes()
    x_budget = max(1 << 20, vmem_cap // 16)          # per-buffer x budget
    tb, b_pad = _choose_batch_tile(B, L, H, itemsize, x_budget)

    x = inputs
    if b_pad != B:
        x = jnp.pad(x, ((0, b_pad - B), (0, 0), (0, 0)))

    grid = (b_pad // tb,)
    out_shape = (jax.ShapeDtypeStruct((b_pad, H), inputs.dtype),
                 jax.ShapeDtypeStruct((b_pad, L), inputs.dtype))
    out_specs = [pl.BlockSpec((tb, H), lambda b: (b, 0)),
                 pl.BlockSpec((tb, L), lambda b: (b, 0))]
    compiler_params = pltpu.CompilerParams(
        dimension_semantics=("parallel",),
        vmem_limit_bytes=int(max(32 << 20, min(int(vmem_cap * 0.6),
                                               512 << 20))),
    )

    if lengths is None:
        # Specialized unmasked kernel: no iota / compare / mask passes.
        rep, attn = pl.pallas_call(
            _attention_kernel_nomask,
            grid=grid,
            in_specs=[
                pl.BlockSpec((tb, L, H), lambda b: (b, 0, 0)),
                pl.BlockSpec((1, H), lambda b: (0, 0)),
            ],
            out_specs=out_specs,
            out_shape=out_shape,
            compiler_params=compiler_params,
        )(x, att_weights)
    else:
        lengths_arr = jnp.asarray(lengths, dtype=jnp.int32).reshape(B, 1)
        if b_pad != B:
            # Padded rows get length L (their x rows are zero -> uniform attn,
            # zero rep, no 0/0).
            lengths_arr = jnp.pad(lengths_arr, ((0, b_pad - B), (0, 0)),
                                  constant_values=L)
        rep, attn = pl.pallas_call(
            _attention_kernel_masked,
            grid=grid,
            in_specs=[
                pl.BlockSpec((tb, L, H), lambda b: (b, 0, 0)),
                pl.BlockSpec((1, H), lambda b: (0, 0)),
                pl.BlockSpec((tb, 1), lambda b: (b, 0)),
            ],
            out_specs=out_specs,
            out_shape=out_shape,
            compiler_params=compiler_params,
        )(x, att_weights, lengths_arr)

    if b_pad != B:
        rep, attn = rep[:B], attn[:B]
    return rep, attn


# --------------------------------------------------------------------------
# Plain-JAX reference (mirrors the PyTorch forward)
# --------------------------------------------------------------------------
def _reference(inputs, w, lengths=None):
    B, L, H = inputs.shape
    scores = jnp.maximum(
        jnp.einsum("blh,h->bl", inputs.astype(jnp.float32), w[0].astype(jnp.float32)),
        0.0)
    p = jax.nn.softmax(scores, axis=-1)
    if lengths is None:
        mask = jnp.ones((B, L), dtype=jnp.float32)
    else:
        pos = jnp.arange(L)[None, :]
        mask = (pos < jnp.asarray(lengths)[:, None]).astype(jnp.float32)
    masked = p * mask
    attn = masked / jnp.sum(masked, axis=-1, keepdims=True)
    rep = jnp.sum(inputs.astype(jnp.float32) * attn[:, :, None], axis=1)
    return rep.astype(inputs.dtype), attn.astype(inputs.dtype)


if __name__ == "__main__":
    key = jax.random.PRNGKey(0)

    # ---- Case 1/2: module-sized small shapes: batch=2, seq=8, hidden=32 ----
    B, L, H = 2, 8, 32
    k_x, k_w, k_x2 = jax.random.split(key, 3)

    x = jax.random.normal(k_x, (B, L, H), dtype=jnp.float32)
    stdv = 1.0 / float(jnp.sqrt(jnp.float32(H)))
    w = jax.random.uniform(k_w, (1, H), minval=-stdv, maxval=stdv,
                           dtype=jnp.float32)

    # Path 1: lengths=None (specialized unmasked kernel)
    rep, attn = attention_forward(x, w)
    rep = jax.block_until_ready(rep)
    attn = jax.block_until_ready(attn)
    rep_ref, attn_ref = _reference(x, w)
    assert rep.shape == (B, H) and attn.shape == (B, L)
    assert rep.dtype == x.dtype and attn.dtype == x.dtype
    assert jnp.allclose(rep, rep_ref, atol=1e-5, rtol=1e-5)
    assert jnp.allclose(attn, attn_ref, atol=1e-5, rtol=1e-5)

    # Path 2: explicit lengths (fused mask + renormalization)
    lengths = jnp.array([L, 5], dtype=jnp.int32)
    rep_m, attn_m = attention_forward(x, w, lengths)
    rep_m = jax.block_until_ready(rep_m)
    attn_m = jax.block_until_ready(attn_m)
    rep_mref, attn_mref = _reference(x, w, lengths)
    assert jnp.allclose(rep_m, rep_mref, atol=1e-5, rtol=1e-5)
    assert jnp.allclose(attn_m, attn_mref, atol=1e-5, rtol=1e-5)

    # ---- Case 3: exercises multi-step grid + batch padding + masking ------
    B2, L2, H2 = 20, 16, 128
    x2 = jax.random.normal(k_x2, (B2, L2, H2), dtype=jnp.float32)
    w2 = jax.random.uniform(k_w, (1, H2), minval=-stdv, maxval=stdv,
                            dtype=jnp.float32)
    lengths2 = (jnp.arange(B2, dtype=jnp.int32) % L2) + 1   # 1..16, no zeros
    rep2, attn2 = attention_forward(x2, w2, lengths2)
    rep2 = jax.block_until_ready(rep2)
    attn2 = jax.block_until_ready(attn2)
    rep2_ref, attn2_ref = _reference(x2, w2, lengths2)
    assert rep2.shape == (B2, H2) and attn2.shape == (B2, L2)
    assert jnp.allclose(rep2, rep2_ref, atol=1e-5, rtol=1e-5)
    assert jnp.allclose(attn2, attn2_ref, atol=1e-5, rtol=1e-5)

    print("KERNEL_OK")
</pallas_src>

<mosaic_0001>
module attributes {stable_mosaic.version = 11 : i64} {
  func.func @_attention_kernel_nomask(%arg0: i32, %arg1: memref<2x8x32xf32, #tpu.memory_space<vmem>>, %arg2: memref<1x32xf32, #tpu.memory_space<vmem>>, %arg3: memref<2x32xf32, #tpu.memory_space<vmem>>, %arg4: memref<2x8xf32, #tpu.memory_space<vmem>>) attributes {dimension_semantics = [#tpu.dimension_semantics<parallel>], iteration_bounds = array<i64: 1>, scalar_prefetch = 0 : i64, scratch_operands = 0 : i64, tpu.core_type = #tpu.core_type<tc>, window_params = [{transform_indices = @transform_0, window_bounds = array<i64: 2, 8, 32>}, {pipeline_mode = #tpu.pipeline_mode<synchronous>, transform_indices = @transform_1, window_bounds = array<i64: 1, 32>}, {transform_indices = @transform_2, window_bounds = array<i64: 2, 32>}, {transform_indices = @transform_3, window_bounds = array<i64: 2, 8>}]} {
    %c0 = arith.constant 0 : index
    %c0_0 = arith.constant 0 : index
    %0 = vector.load %arg2[%c0, %c0_0] : memref<1x32xf32, #tpu.memory_space<vmem>>, vector<1x32xf32>
    %c0_1 = arith.constant 0 : index
    %c0_2 = arith.constant 0 : index
    %c0_3 = arith.constant 0 : index
    %1 = vector.load %arg1[%c0_1, %c0_2, %c0_3] : memref<2x8x32xf32, #tpu.memory_space<vmem>>, vector<2x8x32xf32>
    %2 = vector.shape_cast %0 : vector<1x32xf32> to vector<1x1x32xf32>
    %3 = vector.broadcast %2 : vector<1x1x32xf32> to vector<2x8x32xf32>
    %4 = arith.mulf %1, %3 : vector<2x8x32xf32>
    %cst = arith.constant dense<0.000000e+00> : vector<2x8xf32>
    %5 = vector.multi_reduction <add>, %4, %cst [2] : vector<2x8x32xf32> to vector<2x8xf32>
    %cst_4 = arith.constant 0.000000e+00 : f32
    %6 = vector.broadcast %cst_4 : f32 to vector<2x8xf32>
    %7 = arith.maximumf %5, %6 : vector<2x8xf32>
    %cst_5 = arith.constant dense<0xFF800000> : vector<2xf32>
    %8 = vector.multi_reduction <maximumf>, %7, %cst_5 [1] : vector<2x8xf32> to vector<2xf32>
    %9 = vector.shape_cast %8 : vector<2xf32> to vector<2x1xf32>
    %10 = vector.broadcast %9 : vector<2x1xf32> to vector<2x8xf32>
    %11 = arith.subf %7, %10 : vector<2x8xf32>
    %12 = math.exp %11 : vector<2x8xf32>
    %cst_6 = arith.constant dense<0.000000e+00> : vector<2xf32>
    %13 = vector.multi_reduction <add>, %12, %cst_6 [1] : vector<2x8xf32> to vector<2xf32>
    %14 = vector.shape_cast %13 : vector<2xf32> to vector<2x1xf32>
    %15 = tpu.reciprocal %14 : vector<2x1xf32> -> vector<2x1xf32>
    %16 = vector.broadcast %15 : vector<2x1xf32> to vector<2x8xf32>
    %17 = arith.mulf %12, %16 : vector<2x8xf32>
    %c0_7 = arith.constant 0 : index
    %c0_8 = arith.constant 0 : index
    %c0_9 = arith.constant 0 : index
    %18 = vector.load %arg1[%c0_7, %c0_8, %c0_9] : memref<2x8x32xf32, #tpu.memory_space<vmem>>, vector<2x8x32xf32>
    %19 = vector.shape_cast %17 : vector<2x8xf32> to vector<2x8x1xf32>
    %20 = vector.broadcast %19 : vector<2x8x1xf32> to vector<2x8x32xf32>
    %21 = arith.mulf %18, %20 : vector<2x8x32xf32>
    %cst_10 = arith.constant dense<0.000000e+00> : vector<2x32xf32>
    %22 = vector.multi_reduction <add>, %21, %cst_10 [1] : vector<2x8x32xf32> to vector<2x32xf32>
    %c0_11 = arith.constant 0 : index
    %c0_12 = arith.constant 0 : index
    %23 = vector.load %arg3[%c0_11, %c0_12] : memref<2x32xf32, #tpu.memory_space<vmem>>, vector<2x32xf32>
    tpu.vector_store %arg3[%c0_11, %c0_12], %22 {strides = array<i32>} : memref<2x32xf32, #tpu.memory_space<vmem>>, vector<2x32xf32>,
    %c0_13 = arith.constant 0 : index
    %c0_14 = arith.constant 0 : index
    %24 = vector.load %arg4[%c0_13, %c0_14] : memref<2x8xf32, #tpu.memory_space<vmem>>, vector<2x8xf32>
    tpu.vector_store %arg4[%c0_13, %c0_14], %17 {strides = array<i32>} : memref<2x8xf32, #tpu.memory_space<vmem>>, vector<2x8xf32>,
    return
  }
  func.func @transform_0(%arg0: i32) -> (i32, i32, i32) {
    %c0_i32 = arith.constant 0 : i32
    %c0_i32_0 = arith.constant 0 : i32
    %c0_i32_1 = arith.constant 0 : i32
    return %arg0, %c0_i32, %c0_i32_0 : i32, i32, i32
  }
  func.func @transform_1(%arg0: i32) -> (i32, i32) {
    %c0_i32 = arith.constant 0 : i32
    %c0_i32_0 = arith.constant 0 : i32
    %c0_i32_1 = arith.constant 0 : i32
    return %c0_i32, %c0_i32_0 : i32, i32
  }
  func.func @transform_2(%arg0: i32) -> (i32, i32) {
    %c0_i32 = arith.constant 0 : i32
    %c0_i32_0 = arith.constant 0 : i32
    return %arg0, %c0_i32 : i32, i32
  }
  func.func @transform_3(%arg0: i32) -> (i32, i32) {
    %c0_i32 = arith.constant 0 : i32
    %c0_i32_0 = arith.constant 0 : i32
    return %arg0, %c0_i32 : i32, i32
  }
}

</mosaic_0001>

<bundles_post_ra>
// kernel: tpu_custom_call.1
= control target key start
LH: loop header
LB: loop body
LE: loop exit
PB: predicated region body
PF: predicated region fallthrough
CT: control target
= control target key end

     0   :  { %9 = vsyncpa [#allocation3], 0  ;;  %s359_s0 = inlined_call_operand.hbm [shape: f32[2,8,32], index: 0, kind: input, shape index: {}]   ;;  %s360_s1 = inlined_call_operand.vmem [shape: f32[1,32], index: 1, kind: input, shape index: {}]   ;;  %s361_s2 = inlined_call_operand.hbm [shape: f32[2,32], index: 2, kind: output, shape index: {0}]   ;;  %s362_s3 = inlined_call_operand.hbm [shape: f32[2,8], index: 3, kind: output, shape index: {1}]  }
   0x1   :  { %10 = vsyncpa [#allocation4], 0 }
   0x2   :  { %11 = vsyncpa [#allocation7], 0  ;;  %s279_s12 = smov [#allocation2]   ;;  %s207_s16 = scalar_lea.hbm %s359_s0, 256 }
   0x3   :  { %s17_s13 = sshll.u32 %s279_s12, 4  ;;  %p208_p0 = scmp.ne.s32.totalorder %s359_s0, %s207_s16  ;;  %s18_s13 = int_to_ptr.vmem [resolvable:$true] %s17_s13 }
   0x4   :  { %p211_p1 = scmp.lt.u32.totalorder %s207_s16, %s359_s0 }
   0x6   :  { %p213_p2 = pnand %p211_p1, %p208_p0 }
   0x8   :  { %216 = shalt.err (!%p213_p2)
}
   0x9   :  { %s217_s21 = scalar_lea.vmem %s18_s13, 256  ;;  %p222_p4 = scmp.lt.s32.totalorder %s18_s13, %s18_s13 }
   0xa   :  { %p218_p3 = scmp.ne.s32.totalorder %s18_s13, %s217_s21  ;;  %p223_p5 = scmp.lt.s32.totalorder %s217_s21, %s217_s21 }
   0xc   :  { %p224_p6 = por %p223_p5, %p222_p4 }
   0xe   :  { %p225_p7 = pnand %p224_p6, %p218_p3 }
  0x10   :  { %228 = shalt.err (!%p225_p7)
}
  0x11   :  { %s280_s22 = smov 128   ;;  %s281_s23 = smov 8  }
  0x12   :  { %23 = dma.hbm_to_vmem [thread:$0]  %s359_s0, 256, %s18_s13, [#allocation3], %s280_s22, %s280_s22, %s281_s23  }
  0x13   :  { %273 = dma.done.wait [#allocation3], 256  }
  0x14   :  { %274 = vsyncadd [#allocation3], 4294967040  ;;  %v192_v0 = vld [vmem:[%s360_s1] ss:$0 sm:$0xff]  ;;  %vm40_vm0 = vcmask 261120   ;;  %v320_v2 = vld [vmem:[#allocation2 + $0x8] sm:$0xff]  ;;  %v51_v7 = vlaneseq }
  0x15   :  { %v30_v1 = vld [vmem:[#allocation2] sm:$0xff]  ;;  %v39_v4 = vmul.f32 %v192_v0, %v320_v2  ;;  %vm61_vm1 = vcmask 1041409   ;;  %vm64_vm2 = vcmask 58368   ;;  %v282_v19 = vmov 0   ;;  %s283_s0 = smov [#allocation6]  }
  0x16   :  { %v38_v3 = vmul.f32 %v192_v0, %v30_v1  ;;  %v52_v8 = vand.u32 127, %v51_v7  ;;  %v54_v9 = vshrl.u32 %v51_v7, 7  ;;  %200 = vset.pattern.permute.xlu0 %v282_v19  ;;  %199 = vset.pattern.permute.xlu1 %v282_v19  ;;  %s179_s1 = sshll.u32 %s283_s0, 4  ;;  %s180_s1 = int_to_ptr.vmem [resolvable:$true] %s179_s1 }
  0x17   :  { %v44_v6 = vsel %vm40_vm0, %v39_v4, 0.0  ;;  %s229_s28 = scalar_lea.vmem %s180_s1, 32  ;;  %p234_p9 = scmp.lt.s32.totalorder %s180_s1, %s180_s1 }
  0x18   :  { %v41_v5 = vsel %vm40_vm0, %v38_v3, 0.0  ;;  %v55_v11 = vsub.s32 %v52_v8, %v54_v9  ;;  %v71_v20 = vsub.s32 0, %v54_v9  ;;  %v75_v21 = vsub.s32 1, %v54_v9  ;;  %p230_p8 = scmp.ne.s32.totalorder %s180_s1, %s229_s28  ;;  %p235_p10 = scmp.lt.s32.totalorder %s229_s28, %s229_s28 }
  0x19   :  { %42 = vadd.xlane.f32.xlu0 %v41_v5 }
  0x1a   :  { %p236_p11 = por %p235_p10, %p234_p9 }
  0x1c   :  { %p237_p12 = pnand %p236_p11, %p230_p8 }
  0x1d   :  { %45 = vadd.xlane.f32.xlu0 %v44_v6 }
  0xa6   :  { %v43_v10 = vpop.xlane.xlu0 %42 }
  0xa7   :  { %v47_v12 = vmax.f32 %v43_v10, 0.0 }
  0xa9   :  { %v56_v15 = vrot.slane %v47_v12, %v55_v11 }
  0xaa   :  { %v46_v13 = vpop.xlane.xlu0 %45 }
  0xab   :  { %v48_v14 = vmax.f32 %v46_v13, 0.0 }
  0xad   :  { %v60_v16 = vrot.slane %v48_v14, %v55_v11 }
  0xaf   :  { %v62_v17 = vsel %vm61_vm1, %v60_v16, %v56_v15 }
  0xb0   :  { %v65_v18 = vsel %vm64_vm2, %v62_v17, -inf }
  0xb1   :  { %66 = vmax.xlane.f32.xlu1 %v65_v18 }
 0x13e   :  { %v67_v22 = vpop.xlane.xlu1 %66 }
 0x13f   :  { %v72_v23 = vrot.slane %v67_v22, %v71_v20  ;;  %v76_v24 = vrot.slane %v67_v22, %v75_v21 }
 0x141   :  { %v79_v25 = vsub.f32 %v47_v12, %v72_v23  ;;  %v80_v26 = vsub.f32 %v48_v14, %v76_v24 }
 0x143   :  { %v81_v27 = vmul.f32 1.442695, %v79_v25  ;;  %v83_v28 = vmul.f32 1.442695, %v80_v26 }
 0x145   :  { %201 = vpow2.f32 %v81_v27 }
 0x146   :  { %203 = vpow2.f32 %v83_v28 }
 0x14f   :  { %v202_v29 = vpop.eup %201 }
 0x150   :  { %v204_v30 = vpop.eup %203  ;;  %88 = vperm.xlu1 %199, %v202_v29  }
 0x151   :  { %91 = vperm.xlu0 %200, %v204_v30  }
 0x1cf   :  { %v89_v31 = vpop.permute.xlu1 %88 }
 0x1d0   :  { %v92_v32 = vpop.permute.xlu0 %91  ;;  %v96_v33 = vrot.slane %v89_v31, %v55_v11 }
 0x1d1   :  { %v100_v34 = vrot.slane %v92_v32, %v55_v11 }
 0x1d3   :  { %v101_v35 = vsel %vm61_vm1, %v100_v34, %v96_v33 }
 0x1d4   :  { %v103_v36 = vsel %vm64_vm2, %v101_v35, 0.0 }
 0x1d5   :  { %104 = vadd.xlane.f32.xlu1 %v103_v36 }
 0x262   :  { %v105_v37 = vpop.xlane.xlu1 %104 }
 0x263   :  { %205 = vrcp.f32 %v105_v37 }
 0x26d   :  { %v206_v38 = vpop.eup %205 }
 0x26e   :  { %v111_v39 = vrot.slane %v206_v38, %v71_v20  ;;  %v115_v41 = vrot.slane %v206_v38, %v75_v21 }
 0x270   :  { %v118_v40 = vmul.f32 %v202_v29, %v111_v39  ;;  %v119_v42 = vmul.f32 %v204_v30, %v115_v41 }
 0x272   :  { %122 = vperm.xlu0 %200, %v118_v40  }
 0x276   :  { %127 = vperm.xlu0 %200, %v119_v42  }
 0x2f1   :  { %v123_v43 = vpop.permute.xlu0 %122 }
 0x2f2   :  { %v130_v44 = vmul.f32 %v123_v43, %v30_v1  ;;  %v155_v48 = vrot.slane %v123_v43, %v55_v11 }
 0x2f4   :  { %v132_v45 = vsel %vm40_vm0, %v130_v44, 0.0 }
 0x2f5   :  { %v133_v46 = vrot.slane %v132_v45, 4  ;;  %v128_v47 = vpop.permute.xlu0 %127 }
 0x2f6   :  { %v131_v49 = vmul.f32 %v128_v47, %v320_v2  ;;  %v159_v50 = vrot.slane %v128_v47, %v55_v11 }
 0x2f7   :  { %v134_v51 = vadd.f32 %v133_v46, %v132_v45 }
 0x2f8   :  { %v139_v52 = vsel %vm40_vm0, %v131_v49, 0.0  ;;  %v160_v53 = vsel %vm61_vm1, %v159_v50, %v155_v48 }
 0x2f9   :  { %v135_v54 = vrot.slane %v134_v51, 2  ;;  %v140_v55 = vrot.slane %v139_v52, 4  ;;  %162 = vst.msk [vmem:[#allocation6] sm:$0x3] %vm64_vm2, %v160_v53 }
 0x2fa   :  { %240 = shalt.err (!%p237_p12)
}
 0x2fb   :  { %s241_s4 = scalar_lea.hbm %s362_s3, 32 }
 0x2fc   :  { %p242_p13 = scmp.ne.s32.totalorder %s362_s3, %s241_s4  ;;  %p245_p0 = scmp.lt.u32.totalorder %s241_s4, %s362_s3 }
 0x2fe   :  { %p247_p1 = pnand %p245_p0, %p242_p13 }
 0x300   :  { %250 = shalt.err (!%p247_p1)
}
 0x301   :  { %182 = dma.vmem_to_hbm [thread:$0]  %s180_s1, 32, %s362_s3, [#allocation7]   ;;  %v136_v56 = vadd.f32 %v135_v54, %v134_v51  ;;  %v141_v57 = vadd.f32 %v140_v55, %v139_v52  ;;  %vm150_vm3 = vcmask 254976  }
 0x302   :  { %s284_s11 = smov [#allocation5]  }
 0x303   :  { %v142_v58 = vrot.slane %v141_v57, 2  ;;  %v137_v59 = vrot.slane %v136_v56, 1  ;;  %s169_s12 = sshll.u32 %s284_s11, 4  ;;  %s170_s12 = int_to_ptr.vmem [resolvable:$true] %s169_s12 }
 0x304   :  { %s251_s13 = scalar_lea.vmem %s170_s12, 32  ;;  %p256_p3 = scmp.lt.s32.totalorder %s170_s12, %s170_s12 }
 0x305   :  { %v143_v60 = vadd.f32 %v142_v58, %v141_v57  ;;  %v138_v63 = vadd.f32 %v137_v59, %v136_v56  ;;  %p252_p2 = scmp.ne.s32.totalorder %s170_s12, %s251_s13  ;;  %p257_p4 = scmp.lt.s32.totalorder %s251_s13, %s251_s13 }
 0x307   :  { %v144_v61 = vrot.slane %v143_v60, 1  ;;  %p258_p5 = por %p257_p4, %p256_p3 }
 0x309   :  { %v145_v62 = vadd.f32 %v144_v61, %v143_v60  ;;  %p259_p6 = pnand %p258_p5, %p252_p2 }
 0x30b   :  { %v148_v0 = vsel %vm61_vm1, %v145_v62, %v138_v63 }
 0x30c   :  { %151 = vst.msk [vmem:[#allocation5] sm:$0x3] %vm150_vm3, %v148_v0 }
 0x30d   :  { %262 = shalt.err (!%p259_p6)
}
 0x30e   :  { %s263_s15 = scalar_lea.hbm %s361_s2, 32 }
 0x30f   :  { %p264_p7 = scmp.ne.s32.totalorder %s361_s2, %s263_s15  ;;  %p267_p8 = scmp.lt.u32.totalorder %s263_s15, %s361_s2 }
 0x311   :  { %p269_p9 = pnand %p267_p8, %p264_p7 }
 0x313   :  { %272 = shalt.err (!%p269_p9)
}
 0x314   :  { %172 = dma.vmem_to_hbm [thread:$0]  %s170_s12, 32, %s361_s2, [#allocation4]  }
 0x315   :  { %275 = dma.done.wait [#allocation4], 32  }
 0x316   :  { %276 = vsyncadd [#allocation4], 4294967264 }
 0x317   :  { %277 = dma.done.wait [#allocation7], 32  }
 0x318   :  { %278 = vsyncadd [#allocation7], 4294967264 }
 0x319   :  { %189 = vsyncpa [#allocation3], 1 }
 0x31a   :  { %190 = vsyncpa [#allocation4], 1 }
 0x31b   :  { %191 = vsyncpa [#allocation7], 1 }

</bundles_post_ra>
